<compile_context>
chip_gen: v6e
topology: v6e:2x2x1
jax: 0.10.0
libtpu: 0.0.40
codegen_flags: <defaults>
</compile_context>

<pallas_src>
import jax
import jax.numpy as jnp
from jax.experimental import pallas as pl
from jax.experimental.pallas import tpu as pltpu


def _linear_kernel(x_ref, w_ref, b_ref, o_ref):
    # x_ref: (tm, Kx), w_ref: (Kx, Nw), b_ref: (1, Nw), o_ref: (tm, Nw)
    acc = jnp.dot(x_ref[...], w_ref[...], preferred_element_type=jnp.float32)
    o_ref[...] = (acc + b_ref[...]).astype(o_ref.dtype)


def _round_up(v, m):
    return ((v + m - 1) // m) * m


def _chip_defaults():
    """Returns (default tile_m in original rows, TensorCores per chip)."""
    try:
        kind = jax.devices()[0].device_kind.lower()
    except Exception:
        kind = ""
    if "v7" in kind or "7x" in kind:
        return 32768, 2      # ~3.2 TB/s HBM, 2 TCs, 64 MiB VMEM
    if "v6" in kind:
        return 16384, 1
    if "v5" in kind:
        return 16384, 1
    return 16384, 1


def _plan_grid(m_rows, row_bytes, tile_rows, n_cores, row_align=8):
    """Pick (tile, grid) along the row axis; tile % row_align == 0 unless tile == m_rows."""
    if tile_rows >= m_rows or m_rows <= row_align:
        # One step covers everything.  Only split if a 2nd TensorCore exists AND each
        # half would still be a worthwhile (>= ~2 MiB) step; otherwise splitting just
        # adds a second ~0.35 us step with zero parallelism gain (v5e/v6e are 1 TC).
        if n_cores >= 2 and m_rows > 2 * row_align and m_rows * row_bytes >= (4 << 20):
            grid = 2
        else:
            return m_rows, 1
    else:
        grid = pl.cdiv(m_rows, tile_rows)
        if n_cores >= 2:
            if grid < 4 and m_rows >= 4 * row_align:
                grid = 4              # >= 2 steps per core -> intra-core pipelining
            grid += grid % 2          # balanced across both v7x TensorCores
    tile = _round_up(pl.cdiv(m_rows, grid), row_align)
    grid = pl.cdiv(m_rows, tile)
    if grid == 1:
        tile = m_rows
    return tile, grid


def _run(x2d, w_t, b_row, out_dtype, tile_rows, n_cores):
    """out = x2d @ w_t + b_row, tiled along rows: (M, Kx) @ (Kx, Nw) -> (M, Nw)."""
    m, kx = x2d.shape
    nw = w_t.shape[1]
    itemsize = jnp.dtype(x2d.dtype).itemsize
    tile, grid = _plan_grid(m, kx * itemsize, tile_rows, n_cores)

    cost = pl.CostEstimate(
        flops=2 * m * kx * nw,
        transcendentals=0,
        bytes_accessed=(x2d.size * itemsize
                        + w_t.size * jnp.dtype(w_t.dtype).itemsize
                        + b_row.size * jnp.dtype(b_row.dtype).itemsize
                        + m * nw * jnp.dtype(out_dtype).itemsize),
    )
    return pl.pallas_call(
        _linear_kernel,
        out_shape=jax.ShapeDtypeStruct((m, nw), out_dtype),
        grid_spec=pltpu.PrefetchScalarGridSpec(
            num_scalar_prefetch=0,
            grid=(grid,),
            in_specs=[
                pl.BlockSpec((tile, kx), lambda i: (i, 0)),
                pl.BlockSpec((kx, nw), lambda i: (0, 0)),   # weight (resident)
                pl.BlockSpec((1, nw), lambda i: (0, 0)),    # bias (resident)
            ],
            out_specs=pl.BlockSpec((tile, nw), lambda i: (i, 0)),
        ),
        compiler_params=pltpu.CompilerParams(
            dimension_semantics=("parallel",),
            # explicit: v5e scoped default is 16 MiB; lane-dense tiles need <= ~14 MiB
            vmem_limit_bytes=32 * 1024 * 1024,
        ),
        cost_estimate=cost,
    )(x2d, w_t, b_row)


def logistic_forward(x, weight, bias, *, input_dim, tile_m=None, compute_dtype=None):
    """Equivalent of Logistic.forward: linear(x.view(-1, input_dim)).

    weight: (output_dim, input_dim) -- PyTorch convention.
    bias:   (output_dim,)
    tile_m: row tile size (original rows); default picked per TPU generation.
    compute_dtype: e.g. jnp.bfloat16 to halve the x HBM read (accumulation stays
      f32).  Default None keeps exact f32 numerics.
    """
    out_dtype = x.dtype
    x2d = x.reshape(-1, input_dim)          # same as torch .view(-1, input_dim)
    m, k = x2d.shape
    n = weight.shape[0]

    default_tile, n_cores = _chip_defaults()
    tile_rows = int(tile_m) if tile_m is not None else default_tile

    cdt = compute_dtype if compute_dtype is not None else x2d.dtype
    x2d = x2d.astype(cdt)
    w = weight.astype(cdt)
    b = bias.astype(jnp.float32)

    # ---- lane-dense packed path (the review's main lever) ----------------------
    # Pack P = 128 // N original rows per packed row: output block is exactly 128
    # lanes wide (full-width vst, no lane padding) and the x block is P*K wide.
    # Contraction is against a block-diagonal (P*K, 128) embedding of W^T, so no
    # in-kernel relayout is needed.
    pack_ok = (0 < n <= 128) and (128 % n == 0)
    p = (128 // n) if pack_ok else 1
    if pack_ok and p > 1 and p * k <= 4096:
        m_pad = _round_up(m, p)
        if m_pad != m:
            x2d = jnp.pad(x2d, ((0, m_pad - m), (0, 0)))
        x_packed = x2d.reshape(m_pad // p, p * k)           # free bitcast (contiguous)
        w_big = jnp.kron(jnp.eye(p, dtype=w.dtype), w.T)    # (P*K, 128) block-diagonal
        b_big = jnp.tile(b, p).reshape(1, 128)
        out_packed = _run(x_packed, w_big, b_big, out_dtype,
                          tile_rows=max(1, tile_rows // p), n_cores=n_cores)
        out = out_packed.reshape(m_pad, n)
        return out[:m] if m_pad != m else out

    # ---- fallback: plain (tm, K) @ (K, N) path (always valid) ------------------
    w_t = w.T                                # pre-transpose once in the wrapper
    b_row = b.reshape(1, n)
    return _run(x2d, w_t, b_row, out_dtype, tile_rows=tile_rows, n_cores=n_cores)


if __name__ == "__main__":
    # Module config (matches Logistic(input_dim, output_dim))
    input_dim = 32
    output_dim = 16

    key = jax.random.PRNGKey(0)
    kx, kw, kb, kx2 = jax.random.split(key, 4)

    # Small input with a non-trivial leading shape; forward flattens to (-1, 32) -> M = 8.
    x = jax.random.normal(kx, (2, 4, input_dim), dtype=jnp.float32)

    # 1) Module's own init (weights_init): zero weight and bias.
    w0 = jnp.zeros((output_dim, input_dim), jnp.float32)
    b0 = jnp.zeros((output_dim,), jnp.float32)
    out0 = jax.block_until_ready(logistic_forward(x, w0, b0, input_dim=input_dim))
    ref0 = x.reshape(-1, input_dim) @ w0.T + b0
    assert out0.shape == (8, output_dim)
    assert jnp.allclose(out0, ref0, atol=1e-5), "mismatch (zero init)"

    # 2) Random params, exact f32 path.
    w1 = jax.random.normal(kw, (output_dim, input_dim), jnp.float32) * 0.1
    b1 = jax.random.normal(kb, (output_dim,), jnp.float32) * 0.1
    out1 = jax.block_until_ready(logistic_forward(x, w1, b1, input_dim=input_dim))
    ref1 = x.reshape(-1, input_dim) @ w1.T + b1
    assert jnp.allclose(out1, ref1, atol=1e-5), "mismatch (random params)"

    # 3) Tiled + row-padded path: M = 518 (not a multiple of 8), small tile -> multi-step grid.
    x3 = jax.random.normal(kx2, (37, 14, input_dim), dtype=jnp.float32)
    out3 = jax.block_until_ready(
        logistic_forward(x3, w1, b1, input_dim=input_dim, tile_m=128))
    ref3 = x3.reshape(-1, input_dim) @ w1.T + b1
    assert out3.shape == ref3.shape
    assert jnp.allclose(out3, ref3, atol=1e-4), "mismatch (tiled/padded path)"

    # 4) bf16-input fast path (f32 accumulation; looser tolerance per review).
    out4 = jax.block_until_ready(
        logistic_forward(x3, w1, b1, input_dim=input_dim, compute_dtype=jnp.bfloat16))
    assert jnp.allclose(out4, ref3, atol=5e-2, rtol=5e-2), "mismatch (bf16 path)"

    # 5) Fallback path for an output_dim that does not divide 128.
    w5 = jax.random.normal(kw, (10, input_dim), jnp.float32) * 0.1
    b5 = jax.random.normal(kb, (10,), jnp.float32) * 0.1
    out5 = jax.block_until_ready(logistic_forward(x, w5, b5, input_dim=input_dim))
    ref5 = x.reshape(-1, input_dim) @ w5.T + b5
    assert jnp.allclose(out5, ref5, atol=1e-5), "mismatch (fallback path)"

    print("KERNEL_OK")
</pallas_src>

<mosaic_0001>
module attributes {stable_mosaic.version = 11 : i64} {
  func.func @_linear_kernel(%arg0: i32, %arg1: memref<1x256xf32, #tpu.memory_space<vmem>>, %arg2: memref<256x128xf32, #tpu.memory_space<vmem>>, %arg3: memref<1x128xf32, #tpu.memory_space<vmem>>, %arg4: memref<1x128xf32, #tpu.memory_space<vmem>>) attributes {dimension_semantics = [#tpu.dimension_semantics<parallel>], iteration_bounds = array<i64: 1>, scalar_prefetch = 0 : i64, scratch_operands = 0 : i64, tpu.core_type = #tpu.core_type<tc>, window_params = [{transform_indices = @transform_0, window_bounds = array<i64: 1, 256>}, {pipeline_mode = #tpu.pipeline_mode<synchronous>, transform_indices = @transform_1, window_bounds = array<i64: 256, 128>}, {pipeline_mode = #tpu.pipeline_mode<synchronous>, transform_indices = @transform_2, window_bounds = array<i64: 1, 128>}, {transform_indices = @transform_3, window_bounds = array<i64: 1, 128>}]} {
    %c0 = arith.constant 0 : index
    %c0_0 = arith.constant 0 : index
    %0 = vector.load %arg1[%c0, %c0_0] : memref<1x256xf32, #tpu.memory_space<vmem>>, vector<1x256xf32>
    %c0_1 = arith.constant 0 : index
    %c0_2 = arith.constant 0 : index
    %1 = vector.load %arg2[%c0_1, %c0_2] : memref<256x128xf32, #tpu.memory_space<vmem>>, vector<256x128xf32>
    %cst = arith.constant dense<0.000000e+00> : vector<1x128xf32>
    %2 = tpu.matmul %0, %1, %cst {dimension_numbers = #tpu.dot_dimension_numbers<[1], [0], [0], [1], [0, 0, 1, 1], [], []>} : vector<1x256xf32>, vector<256x128xf32>, vector<1x128xf32> -> vector<1x128xf32>
    %c0_3 = arith.constant 0 : index
    %c0_4 = arith.constant 0 : index
    %3 = vector.load %arg3[%c0_3, %c0_4] : memref<1x128xf32, #tpu.memory_space<vmem>>, vector<1x128xf32>
    %4 = arith.addf %2, %3 : vector<1x128xf32>
    %c0_5 = arith.constant 0 : index
    %c0_6 = arith.constant 0 : index
    %5 = vector.load %arg4[%c0_5, %c0_6] : memref<1x128xf32, #tpu.memory_space<vmem>>, vector<1x128xf32>
    tpu.vector_store %arg4[%c0_5, %c0_6], %4 {strides = array<i32>} : memref<1x128xf32, #tpu.memory_space<vmem>>, vector<1x128xf32>,
    return
  }
  func.func @transform_0(%arg0: i32) -> (i32, i32) {
    %c0_i32 = arith.constant 0 : i32
    %c0_i32_0 = arith.constant 0 : i32
    return %arg0, %c0_i32 : i32, i32
  }
  func.func @transform_1(%arg0: i32) -> (i32, i32) {
    %c0_i32 = arith.constant 0 : i32
    %c0_i32_0 = arith.constant 0 : i32
    %c0_i32_1 = arith.constant 0 : i32
    return %c0_i32, %c0_i32_0 : i32, i32
  }
  func.func @transform_2(%arg0: i32) -> (i32, i32) {
    %c0_i32 = arith.constant 0 : i32
    %c0_i32_0 = arith.constant 0 : i32
    %c0_i32_1 = arith.constant 0 : i32
    return %c0_i32, %c0_i32_0 : i32, i32
  }
  func.func @transform_3(%arg0: i32) -> (i32, i32) {
    %c0_i32 = arith.constant 0 : i32
    %c0_i32_0 = arith.constant 0 : i32
    return %arg0, %c0_i32 : i32, i32
  }
}

</mosaic_0001>

<bundles_post_ra>
// kernel: tpu_custom_call.1
= control target key start
LH: loop header
LB: loop body
LE: loop exit
PB: predicated region body
PF: predicated region fallthrough
CT: control target
= control target key end

     0   :  { %8 = vsyncpa [#allocation3], 0  ;;  %s316_s0 = inlined_call_operand.hbm [shape: f32[1,256], index: 0, kind: input, shape index: {}]   ;;  %s317_s1 = inlined_call_operand.hbm [shape: f32[256,128], index: 1, kind: input, shape index: {}]   ;;  %s318_s2 = inlined_call_operand.vmem [shape: f32[1,128], index: 2, kind: input, shape index: {}]   ;;  %s319_s3 = inlined_call_operand.hbm [shape: f32[1,128], index: 3, kind: output, shape index: {}]  }
   0x1   :  { %9 = vsyncpa [#allocation6], 0 }
   0x2   :  { %10 = vsyncpa [#allocation4], 0  ;;  %s279_s12 = smov [#allocation2]   ;;  %s280_s14 = smov [#allocation5]  }
   0x3   :  { %s17_s13 = sshll.u32 %s279_s12, 4  ;;  %s26_s15 = sshll.u32 %s280_s14, 4  ;;  %s18_s13 = int_to_ptr.vmem [resolvable:$true] %s17_s13  ;;  %s27_s15 = int_to_ptr.vmem [resolvable:$true] %s26_s15 }
   0x4   :  { %s221_s16 = scalar_lea.vmem %s18_s13, 32  ;;  %p226_p1 = scmp.lt.s32.totalorder %s18_s13, %s18_s13 }
   0x5   :  { %p222_p0 = scmp.ne.s32.totalorder %s18_s13, %s221_s16  ;;  %p227_p2 = scmp.lt.s32.totalorder %s221_s16, %s221_s16 }
   0x7   :  { %p228_p3 = por %p227_p2, %p226_p1 }
   0x9   :  { %p229_p4 = pnand %p228_p3, %p222_p0 }
   0xb   :  { %232 = shalt.err (!%p229_p4)
}
   0xc   :  { %20 = dma.hbm_to_vmem [thread:$0]  %s316_s0, 32, %s18_s13, [#allocation3]  }
   0xd   :  { %s241_s19 = scalar_lea.vmem %s27_s15, 4096  ;;  %p246_p6 = scmp.lt.s32.totalorder %s27_s15, %s27_s15 }
   0xe   :  { %p242_p5 = scmp.ne.s32.totalorder %s27_s15, %s241_s19  ;;  %p247_p7 = scmp.lt.s32.totalorder %s241_s19, %s241_s19 }
  0x10   :  { %p248_p8 = por %p247_p7, %p246_p6 }
  0x12   :  { %p249_p9 = pnand %p248_p8, %p242_p5 }
  0x14   :  { %252 = shalt.err (!%p249_p9)
}
  0x15   :  { %s281_s20 = smov 128   ;;  %s282_s21 = smov 8  }
  0x16   :  { %32 = dma.hbm_to_vmem [thread:$0]  %s317_s1, 4096, %s27_s15, [#allocation6], %s281_s20, %s281_s20, %s282_s21  }
  0x17   :  { %273 = dma.done.wait [#allocation3], 32  }
  0x18   :  { %274 = vsyncadd [#allocation3], 4294967264 }
  0x19   :  { %275 = dma.done.wait [#allocation6], 4096  }
  0x1a   :  { %276 = vsyncadd [#allocation6], 4294963200  ;;  %v76_v0 = vlaneseq  ;;  %v73_v1 = vld [vmem:[#allocation5 + $0xf8] sm:$0xff]  ;;  %v72_v3 = vld [vmem:[#allocation5 + $0xf0] sm:$0xff]  ;;  %s283_s24 = smov [#allocation7]  }
  0x1b   :  { %v57_v2 = vld [vmem:[#allocation5 + $0x78] sm:$0xff]  ;;  %173 = vmatprep.subr.mxu0 %v73_v1  ;;  %v56_v4 = vld [vmem:[#allocation5 + $0x70] sm:$0xff]  ;;  %v71_v5 = vld [vmem:[#allocation5 + $0xe8] sm:$0xff]  ;;  %s163_s25 = sshll.u32 %s283_s24, 4  ;;  %s164_s25 = int_to_ptr.vmem [resolvable:$true] %s163_s25 }
  0x1c   :  { %174 = vmatpush3.msra.mxu0 %v57_v2  ;;  %v55_v6 = vld [vmem:[#allocation5 + $0x68] sm:$0xff]  ;;  %v77_v7 = vshrl.u32 %v76_v0, 7  ;;  %v70_v8 = vld [vmem:[#allocation5 + $0xe0] sm:$0xff]  ;;  %v69_v10 = vld [vmem:[#allocation5 + $0xd8] sm:$0xff]  ;;  %s253_s26 = scalar_lea.vmem %s164_s25, 16  ;;  %s257_s27 = scalar_lea.vmem %s164_s25, 32 }
  0x1d   :  { %175 = vmatprep.subr.mxu0 %v72_v3  ;;  %v54_v9 = vld [vmem:[#allocation5 + $0x60] sm:$0xff]  ;;  %v53_v11 = vld [vmem:[#allocation5 + $0x58] sm:$0xff]  ;;  %v68_v13 = vld [vmem:[#allocation5 + $0xd0] sm:$0xff]  ;;  %p254_p10 = scmp.ne.s32.totalorder %s164_s25, %s253_s26  ;;  %p258_p11 = scmp.lt.s32.totalorder %s164_s25, %s164_s25 }
  0x1e   :  { %176 = vmatpush3.msra.mxu0 %v56_v4  ;;  %v82_v12 = vsub.s32 1, %v77_v7  ;;  %v52_v14 = vld [vmem:[#allocation5 + $0x50] sm:$0xff]  ;;  %v67_v15 = vld [vmem:[#allocation5 + $0xc8] sm:$0xff]  ;;  %v41_v16 = vld [vmem:[#allocation2] sm:$0x3]  ;;  %v78_v33 = vsub.s32 0, %v77_v7  ;;  %p259_p12 = scmp.lt.s32.totalorder %s257_s27, %s253_s26 }
  0x1f   :  { %177 = vmatprep.subr.mxu0 %v71_v5  ;;  %v51_v17 = vld [vmem:[#allocation5 + $0x48] sm:$0xff]  ;;  %v66_v19 = vld [vmem:[#allocation5 + $0xc0] sm:$0xff]  ;;  %v65_v21 = vld [vmem:[#allocation5 + $0xb8] sm:$0xff] }
  0x20   :  { %178 = vmatpush3.msra.mxu0 %v55_v6  ;;  %v83_v18 = vrot.slane %v41_v16, %v82_v12  ;;  %v50_v20 = vld [vmem:[#allocation5 + $0x40] sm:$0xff]  ;;  %v49_v22 = vld [vmem:[#allocation5 + $0x38] sm:$0xff]  ;;  %v64_v23 = vld [vmem:[#allocation5 + $0xb0] sm:$0xff]  ;;  %v79_v38 = vrot.slane %v41_v16, %v78_v33  ;;  %p260_p13 = por %p259_p12, %p258_p11 }
  0x21   :  { %179 = vmatprep.subr.mxu0 %v70_v8  ;;  %v48_v24 = vld [vmem:[#allocation5 + $0x30] sm:$0xff]  ;;  %v63_v25 = vld [vmem:[#allocation5 + $0xa8] sm:$0xff]  ;;  %v62_v27 = vld [vmem:[#allocation5 + $0xa0] sm:$0xff] }
  0x22   :  { %180 = vmatpush3.msra.mxu0 %v54_v9  ;;  %150 = vmatprep.mubr.f32.mxu0 %v83_v18  ;;  %v47_v26 = vld [vmem:[#allocation5 + $0x28] sm:$0xff]  ;;  %v46_v28 = vld [vmem:[#allocation5 + $0x20] sm:$0xff]  ;;  %v61_v29 = vld [vmem:[#allocation5 + $0x98] sm:$0xff]  ;;  %p261_p0 = pnand %p260_p13, %p254_p10 }
  0x23   :  { %181 = vmatprep.subr.mxu0 %v69_v10  ;;  %v45_v30 = vld [vmem:[#allocation5 + $0x18] sm:$0xff]  ;;  %v60_v31 = vld [vmem:[#allocation5 + $0x90] sm:$0xff]  ;;  %v59_v34 = vld [vmem:[#allocation5 + $0x88] sm:$0xff] }
  0x24   :  { %182 = vmatpush3.msra.mxu0 %v53_v11  ;;  %v44_v32 = vld [vmem:[#allocation5 + $0x10] sm:$0xff]  ;;  %v43_v35 = vld [vmem:[#allocation5 + $0x8] sm:$0xff]  ;;  %v58_v36 = vld [vmem:[#allocation5 + $0x80] sm:$0xff] }
  0x25   :  { %183 = vmatprep.subr.mxu0 %v68_v13  ;;  %v42_v37 = vld [vmem:[#allocation5] sm:$0xff]  ;;  %v74_v40 = vld [vmem:[%s318_s2] sm:$0x1] }
  0x26   :  { %184 = vmatpush3.msra.mxu0 %v52_v14 }
  0x27   :  { %185 = vmatprep.subr.mxu0 %v67_v15 }
  0x28   :  { %186 = vmatpush3.msra.mxu0 %v51_v17 }
  0x29   :  { %187 = vmatprep.subr.mxu0 %v66_v19 }
  0x2a   :  { %188 = vmatpush3.msra.mxu0 %v50_v20 }
  0x2b   :  { %189 = vmatprep.subr.mxu0 %v65_v21 }
  0x2c   :  { %190 = vmatpush3.msra.mxu0 %v49_v22 }
  0x2d   :  { %191 = vmatprep.subr.mxu0 %v64_v23 }
  0x2e   :  { %192 = vmatpush3.msra.mxu0 %v48_v24 }
  0x2f   :  { %193 = vmatprep.subr.mxu0 %v63_v25 }
  0x30   :  { %194 = vmatpush3.msra.mxu0 %v47_v26 }
  0x31   :  { %195 = vmatprep.subr.mxu0 %v62_v27 }
  0x32   :  { %196 = vmatpush3.msra.mxu0 %v46_v28 }
  0x33   :  { %197 = vmatprep.subr.mxu0 %v61_v29 }
  0x34   :  { %198 = vmatpush3.msra.mxu0 %v45_v30 }
  0x35   :  { %199 = vmatprep.subr.mxu0 %v60_v31 }
  0x36   :  { %200 = vmatpush3.msra.mxu0 %v44_v32 }
  0x37   :  { %201 = vmatprep.subr.mxu0 %v59_v34 }
  0x38   :  { %202 = vmatpush3.msra.mxu0 %v43_v35 }
  0x39   :  { %203 = vmatprep.subr.mxu0 %v58_v36 }
  0x3a   :  { %204 = vmatpush3.msra.mxu0 %v42_v37 }
  0x3b   :  { %151 = vmatmul.mubr.f32.vlgmr.msra.gmra.mxu0 %v79_v38 }
  0xfb   :  { %v205_v39 = vpop.f32.mrf.mxu0 }
  0xfd   :  { %v206_v41 = vpop.f32.mrf.mxu0 }
  0xfe   :  { %v207_v42 = vadd.f32 %v206_v41, %v205_v39 }
 0x100   :  { %v153_v43 = vadd.f32 %v207_v42, %v74_v40 }
 0x102   :  { %156 = vst [vmem:[#allocation7] sm:$0x1] %v153_v43 }
 0x103   :  { %264 = shalt.err (!%p261_p0)
}
 0x104   :  { %166 = dma.vmem_to_hbm [thread:$0]  %s164_s25, 16, %s319_s3, [#allocation4]  }
 0x105   :  { %277 = dma.done.wait [#allocation4], 16  }
 0x106   :  { %278 = vsyncadd [#allocation4], 4294967280 }
 0x107   :  { %170 = vsyncpa [#allocation3], 1 }
 0x108   :  { %171 = vsyncpa [#allocation6], 1 }
 0x109   :  { %172 = vsyncpa [#allocation4], 1 }

</bundles_post_ra>
